<compile_context>
chip_gen: v7x
topology: tpu7x:2x2x1
jax: 0.10.0
libtpu: 0.0.40
codegen_flags: <defaults>
</compile_context>

<pallas_src>
import functools

import jax
import jax.numpy as jnp
from jax import lax
from jax.experimental import pallas as pl
from jax.experimental.pallas import tpu as pltpu

HIDDEN_UNITS = 5120
NUM_LABELS = 2
DROPOUT_RATE = 0.5


def _net_eval_kernel(x_ref, w_ref, b_ref, o_ref):
    # y = x @ W^T + b : contraction over H on the MXU with f32 accumulation.
    # Weight is (N, H) lane-dense; no transpose materialized.
    y = lax.dot_general(
        x_ref[...], w_ref[...],
        dimension_numbers=(((1,), (1,)), ((), ())),
        preferred_element_type=jnp.float32,
    )
    o_ref[...] = (y + b_ref[...]).astype(o_ref.dtype)


def _net_train_kernel(x_ref, w_ref, b_ref, bits_ref, o_ref, *, rate):
    y = lax.dot_general(
        x_ref[...], w_ref[...],
        dimension_numbers=(((1,), (1,)), ((), ())),
        preferred_element_type=jnp.float32,
    ) + b_ref[...]
    # F.dropout(p=rate, training=True): drop with prob `rate`, scale survivors
    # by 1/(1-rate).  Raw u32 bits vs u32 threshold -- no float convert/shift.
    threshold = jnp.uint32(min(int(round(rate * (1 << 32))), (1 << 32) - 1))
    keep = bits_ref[...] >= threshold
    o_ref[...] = jnp.where(keep, y * (1.0 / (1.0 - rate)), 0.0).astype(o_ref.dtype)


def net_forward(x, weight, bias, *, training=False, rate=DROPOUT_RATE,
                rng_key=None):
    """Forward pass of `Net`.

    x:      (B, H) float32
    weight: (N, H) float32  (PyTorch nn.Linear layout, used as-is)
    bias:   (N,)   float32
    returns (B, N) float32
    """
    B, H = x.shape
    N = weight.shape[0]
    assert weight.shape == (N, H) and bias.shape == (N,)

    b2 = bias.reshape(1, N).astype(jnp.float32)
    out_shape = jax.ShapeDtypeStruct((B, N), x.dtype)
    vmem = pl.BlockSpec(memory_space=pltpu.MemorySpace.VMEM)  # whole array in VMEM

    if (not training) or rate == 0.0:
        return pl.pallas_call(
            _net_eval_kernel,
            out_shape=out_shape,
            in_specs=[vmem, vmem, vmem],
            out_specs=vmem,
        )(x, weight, b2)

    if rng_key is None:
        rng_key = jax.random.PRNGKey(0)
    # TODO(synk): dropout mask bits come from jax.random, not PyTorch's RNG
    # stream; statistics match (p = rate), bit-exact masks do not.
    bits = jax.random.bits(rng_key, (B, N), dtype=jnp.uint32)

    kernel = functools.partial(_net_train_kernel, rate=rate)
    return pl.pallas_call(
        kernel,
        out_shape=out_shape,
        in_specs=[vmem, vmem, vmem, vmem],
        out_specs=vmem,
    )(x, weight, b2, bits)


if __name__ == "__main__":
    key = jax.random.PRNGKey(0)
    k_x, k_w, k_b, k_drop = jax.random.split(key, 4)

    B = 8
    x = jax.random.normal(k_x, (B, HIDDEN_UNITS), dtype=jnp.float32)
    # Deterministic synthetic parameters (shapes from nn.Linear(5120, 2)).
    bound = 1.0 / (HIDDEN_UNITS ** 0.5)
    weight = jax.random.uniform(
        k_w, (NUM_LABELS, HIDDEN_UNITS), dtype=jnp.float32,
        minval=-bound, maxval=bound)
    bias = jax.random.uniform(
        k_b, (NUM_LABELS,), dtype=jnp.float32, minval=-bound, maxval=bound)

    # Eval-mode forward (dropout is identity) -- check against a pure-JAX ref.
    y_eval = jax.block_until_ready(net_forward(x, weight, bias, training=False))
    y_ref = x @ weight.T + bias
    assert jnp.allclose(y_eval, y_ref, atol=1e-4, rtol=1e-4), "mismatch vs reference"

    # Training-mode forward: every output is either 0 or y_ref / (1 - rate).
    y_train = jax.block_until_ready(
        net_forward(x, weight, bias, training=True, rng_key=k_drop))
    assert y_train.shape == (B, NUM_LABELS)
    scaled = y_ref / (1.0 - DROPOUT_RATE)
    ok = (jnp.isclose(y_train, 0.0, atol=1e-6)
          | jnp.isclose(y_train, scaled, atol=1e-4, rtol=1e-4))
    assert bool(jnp.all(ok)), "dropout output not in {0, y/(1-p)}"

    print("KERNEL_OK")
</pallas_src>

<mosaic_0001>
module attributes {stable_mosaic.version = 11 : i64} {
  func.func @_net_eval_kernel(%arg0: memref<8x5120xf32, #tpu.memory_space<vmem>>, %arg1: memref<2x5120xf32, #tpu.memory_space<vmem>>, %arg2: memref<1x2xf32, #tpu.memory_space<vmem>>, %arg3: memref<8x2xf32, #tpu.memory_space<vmem>>) attributes {dimension_semantics = [], scalar_prefetch = 0 : i64, scratch_operands = 0 : i64, tpu.core_type = #tpu.core_type<tc>} {
    %c0 = arith.constant 0 : index
    %c0_0 = arith.constant 0 : index
    %0 = vector.load %arg0[%c0, %c0_0] : memref<8x5120xf32, #tpu.memory_space<vmem>>, vector<8x5120xf32>
    %c0_1 = arith.constant 0 : index
    %c0_2 = arith.constant 0 : index
    %1 = vector.load %arg1[%c0_1, %c0_2] : memref<2x5120xf32, #tpu.memory_space<vmem>>, vector<2x5120xf32>
    %cst = arith.constant dense<0.000000e+00> : vector<8x2xf32>
    %2 = tpu.matmul %0, %1, %cst {dimension_numbers = #tpu.dot_dimension_numbers<[1], [1], [0], [0], [0, 0, 1, 0], [], []>} : vector<8x5120xf32>, vector<2x5120xf32>, vector<8x2xf32> -> vector<8x2xf32>
    %c0_3 = arith.constant 0 : index
    %c0_4 = arith.constant 0 : index
    %3 = vector.load %arg2[%c0_3, %c0_4] : memref<1x2xf32, #tpu.memory_space<vmem>>, vector<1x2xf32>
    %4 = vector.broadcast %3 : vector<1x2xf32> to vector<8x2xf32>
    %5 = arith.addf %2, %4 : vector<8x2xf32>
    %c0_5 = arith.constant 0 : index
    %c0_6 = arith.constant 0 : index
    %6 = vector.load %arg3[%c0_5, %c0_6] : memref<8x2xf32, #tpu.memory_space<vmem>>, vector<8x2xf32>
    tpu.vector_store %arg3[%c0_5, %c0_6], %5 {strides = array<i32>} : memref<8x2xf32, #tpu.memory_space<vmem>>, vector<8x2xf32>,
    return
  }
}

</mosaic_0001>

<bundles_post_ra>
// kernel: tpu_custom_call.1
= control target key start
LH: loop header
LB: loop body
LE: loop exit
PB: predicated region body
PF: predicated region fallthrough
CT: control target
= control target key end

     0   :  { %8 = vsyncpa [#allocation3], 0  ;;  %s1898_s0 = inlined_call_operand.hbm [shape: f32[8,5120], index: 0, kind: input, shape index: {}]   ;;  %s1899_s1 = inlined_call_operand.hbm [shape: f32[2,5120], index: 1, kind: input, shape index: {}]   ;;  %s1900_s2 = inlined_call_operand.vmem [shape: f32[1,2], index: 2, kind: input, shape index: {}]   ;;  %s1901_s3 = inlined_call_operand.vmem [shape: f32[8,2], index: 3, kind: output, shape index: {}]  }
   0x1   :  { %9 = vsyncpa [#allocation5], 0  ;;  %s1823_s12 = smov [#allocation2]   ;;  %s1824_s14 = smov [#allocation4]  }
   0x2   :  { %s16_s13 = sshll.u32 %s1823_s12, 4  ;;  %s26_s15 = sshll.u32 %s1824_s14, 4  ;;  %s17_s13 = int_to_ptr.vmem [resolvable:$true] %s16_s13  ;;  %s27_s15 = int_to_ptr.vmem [resolvable:$true] %s26_s15 }
   0x3   :  { %s1775_s18 = scalar_lea.hbm %s1898_s0, 5120 }
   0x4   :  { %p1776_p0 = scmp.ne.s32.totalorder %s1898_s0, %s1775_s18  ;;  %p1779_p1 = scmp.lt.u32.totalorder %s1775_s18, %s1898_s0 }
   0x6   :  { %p1781_p2 = pnand %p1779_p1, %p1776_p0 }
   0x8   :  { %1784 = shalt.err (!%p1781_p2)
}
   0x9   :  { %s1785_s23 = scalar_lea.vmem %s17_s13, 5120  ;;  %p1790_p4 = scmp.lt.s32.totalorder %s17_s13, %s17_s13 }
   0xa   :  { %p1786_p3 = scmp.ne.s32.totalorder %s17_s13, %s1785_s23  ;;  %p1791_p5 = scmp.lt.s32.totalorder %s1785_s23, %s1785_s23 }
   0xc   :  { %p1792_p6 = por %p1791_p5, %p1790_p4 }
   0xe   :  { %p1793_p7 = pnand %p1792_p6, %p1786_p3 }
  0x10   :  { %1796 = shalt.err (!%p1793_p7)
}
  0x11   :  { %19 = dma.hbm_to_vmem [thread:$0]  %s1898_s0, 5120, %s17_s13, [#allocation3]  }
  0x12   :  { %s1797_s28 = scalar_lea.hbm %s1899_s1, 1280 }
  0x13   :  { %p1798_p8 = scmp.ne.s32.totalorder %s1899_s1, %s1797_s28  ;;  %p1801_p9 = scmp.lt.u32.totalorder %s1797_s28, %s1899_s1 }
  0x15   :  { %p1803_p10 = pnand %p1801_p9, %p1798_p8 }
  0x17   :  { %1806 = shalt.err (!%p1803_p10)
}
  0x18   :  { %s1807_s6 = scalar_lea.vmem %s27_s15, 1280  ;;  %p1812_p12 = scmp.lt.s32.totalorder %s27_s15, %s27_s15 }
  0x19   :  { %p1808_p11 = scmp.ne.s32.totalorder %s27_s15, %s1807_s6  ;;  %p1813_p13 = scmp.lt.s32.totalorder %s1807_s6, %s1807_s6 }
  0x1b   :  { %p1814_p0 = por %p1813_p13, %p1812_p12 }
  0x1d   :  { %p1815_p1 = pnand %p1814_p0, %p1808_p11 }
  0x1f   :  { %1818 = shalt.err (!%p1815_p1)
}
  0x20   :  { %29 = dma.hbm_to_vmem [thread:$0]  %s1899_s1, 1280, %s27_s15, [#allocation5]  }
  0x21   :  { %1819 = dma.done.wait [#allocation3], 5120  }
  0x22   :  { %1820 = vsyncadd [#allocation3], 4294962176 }
  0x23   :  { %1821 = dma.done.wait [#allocation5], 1280  }
  0x24   :  { %1822 = vsyncadd [#allocation5], 4294966016  ;;  %v109_v0 = vlaneseq  ;;  %v1825_v1 = vmov 1983009808   ;;  %v78_v6 = vld [vmem:[#allocation4] sm:$0xff]  ;;  %v83_v7 = vld [vmem:[#allocation4 + $0x28] sm:$0xff] }
  0x25   :  { %v107_v2 = vunpack.c.l.s4 %v1825_v1  ;;  %v39_v8 = vld [vmem:[#allocation2 + $0x8] sm:$0xff]  ;;  %v105_v9 = vcombine.high %v78_v6, %v78_v6  ;;  %v190_v11 = vcombine.high %v83_v7, %v83_v7  ;;  %v84_v19 = vld [vmem:[#allocation4 + $0x30] sm:$0xff]  ;;  %v38_v24 = vld [vmem:[#allocation2] sm:$0xff]  ;;  %vm1715_vm0 = vcmask 15360  }
  0x26   :  { %v110_v3 = vshrl.u32 %v109_v0, 7  ;;  %379 = vmatprep.mubr.f32.mxu1 %v39_v8  ;;  %v59_v13 = vld [vmem:[#allocation2 + $0xa8] sm:$0xff]  ;;  %v58_v25 = vld [vmem:[#allocation2 + $0xa0] sm:$0xff]  ;;  %v41_v26 = vld [vmem:[#allocation2 + $0x18] sm:$0xff]  ;;  %v207_v31 = vcombine.high %v84_v19, %v84_v19 }
  0x27   :  { %v108_v4 = vunpack.c.0.s8 %v107_v2  ;;  %1079 = vmatprep.mubr.f32.mxu0 %v59_v13  ;;  %v79_v18 = vld [vmem:[#allocation4 + $0x8] sm:$0xff]  ;;  %v61_v27 = vld [vmem:[#allocation2 + $0xb8] sm:$0xff]  ;;  %v40_v34 = vld [vmem:[#allocation2 + $0x10] sm:$0xff] }
  0x28   :  { %v122_v30 = vcombine.high %v79_v18, %v79_v18  ;;  %v60_v35 = vld [vmem:[#allocation2 + $0xb0] sm:$0xff]  ;;  %v43_v36 = vld [vmem:[#allocation2 + $0x28] sm:$0xff]  ;;  %v85_v41 = vld [vmem:[#allocation4 + $0x38] sm:$0xff] }
  0x29   :  { %v1870_v5 = vsub.s32 %v108_v4, %v110_v3  ;;  %v63_v37 = vld [vmem:[#allocation2 + $0xc8] sm:$0xff]  ;;  %v80_v40 = vld [vmem:[#allocation4 + $0x10] sm:$0xff]  ;;  %v42_v44 = vld [vmem:[#allocation2 + $0x20] sm:$0xff]  ;;  %v224_v51 = vcombine.high %v85_v41, %v85_v41 }
  0x2a   :  { %v62_v45 = vld [vmem:[#allocation2 + $0xc0] sm:$0xff]  ;;  %v45_v46 = vld [vmem:[#allocation2 + $0x38] sm:$0xff]  ;;  %v139_v50 = vcombine.high %v80_v40, %v80_v40  ;;  %v44_v54 = vld [vmem:[#allocation2 + $0x30] sm:$0xff] }
  0x2b   :  { %v112_v10 = vrot.slane %v78_v6, %v1870_v5  ;;  %v197_v12 = vrot.slane %v83_v7, %v1870_v5  ;;  %v119_v16 = vrot.slane %v105_v9, %v1870_v5  ;;  %v204_v17 = vrot.slane %v190_v11, %v1870_v5  ;;  %v65_v47 = vld [vmem:[#allocation2 + $0xd8] sm:$0xff]  ;;  %v64_v55 = vld [vmem:[#allocation2 + $0xd0] sm:$0xff]  ;;  %v47_v56 = vld [vmem:[#allocation2 + $0x48] sm:$0xff] }
  0x2c   :  { %v129_v20 = vrot.slane %v79_v18, %v1870_v5  ;;  %v214_v21 = vrot.slane %v84_v19, %v1870_v5  ;;  %v136_v32 = vrot.slane %v122_v30, %v1870_v5  ;;  %v221_v33 = vrot.slane %v207_v31, %v1870_v5  ;;  %v67_v57 = vld [vmem:[#allocation2 + $0xe8] sm:$0xff]  ;;  %v81_v60 = vld [vmem:[#allocation4 + $0x18] sm:$0xff]  ;;  %v86_v61 = vld [vmem:[#allocation4 + $0x40] sm:$0xff] }
  0x2d   :  { %v120_v14 = vcombine.high %v112_v10, %v112_v10  ;;  %v205_v15 = vcombine.high %v197_v12, %v197_v12  ;;  %v121_v22 = vcombine.high %v119_v16, %v119_v16  ;;  %v206_v23 = vcombine.high %v204_v17, %v204_v17  ;;  %v46_v0 = vld [vmem:[#allocation2 + $0x40] sm:$0xff]  ;;  %v49_v2 = vld [vmem:[#allocation2 + $0x58] sm:$0xff]  ;;  %v48_v11 = vld [vmem:[#allocation2 + $0x50] sm:$0xff] }
  0x2e   :  { %v137_v28 = vcombine.high %v129_v20, %v129_v20  ;;  %v222_v29 = vcombine.high %v214_v21, %v214_v21  ;;  %v138_v38 = vcombine.high %v136_v32, %v136_v32  ;;  %v223_v39 = vcombine.high %v221_v33, %v221_v33  ;;  %v66_v1 = vld [vmem:[#allocation2 + $0xe0] sm:$0xff]  ;;  %v69_v3 = vld [vmem:[#allocation2 + $0xf8] sm:$0xff]  ;;  %v51_v13 = vld [vmem:[#allocation2 + $0x68] sm:$0xff] }
  0x2f   :  { %315 = vmatprep.subr.mxu1 %v120_v14  ;;  %1015 = vmatprep.subr.mxu0 %v205_v15  ;;  %v146_v42 = vrot.slane %v80_v40, %v1870_v5  ;;  %v231_v43 = vrot.slane %v85_v41, %v1870_v5  ;;  %v153_v52 = vrot.slane %v139_v50, %v1870_v5  ;;  %v71_v14 = vld [vmem:[#allocation2 + $0x108] sm:$0xff]  ;;  %v52_v31 = vld [vmem:[#allocation2 + $0x70] sm:$0xff]  ;;  %v77_v40 = vld [vmem:[#allocation2 + $0x138] sm:$0xff] }
  0x30   :  { %316 = vmatpush1.xpose.msra.mxu1 %v112_v10  ;;  %1016 = vmatpush1.xpose.msra.mxu0 %v197_v12  ;;  %v238_v53 = vrot.slane %v224_v51, %v1870_v5  ;;  %v163_v62 = vrot.slane %v81_v60, %v1870_v5  ;;  %v248_v63 = vrot.slane %v86_v61, %v1870_v5  ;;  %v68_v12 = vld [vmem:[#allocation2 + $0xf0] sm:$0xff]  ;;  %v87_v18 = vld [vmem:[#allocation4 + $0x48] sm:$0xff] }
  0x31   :  { %385 = vmatprep.subr.mxu1 %v121_v22  ;;  %1085 = vmatprep.subr.mxu0 %v206_v23  ;;  %v154_v48 = vcombine.high %v146_v42, %v146_v42  ;;  %v239_v49 = vcombine.high %v231_v43, %v231_v43  ;;  %v155_v58 = vcombine.high %v153_v52, %v153_v52  ;;  %v70_v22 = vld [vmem:[#allocation2 + $0x100] sm:$0xff]  ;;  %v53_v23 = vld [vmem:[#allocation2 + $0x78] sm:$0xff]  ;;  %v76_v41 = vld [vmem:[#allocation2 + $0x130] sm:$0xff] }
  0x32   :  { %v240_v59 = vcombine.high %v238_v53, %v238_v53  ;;  %v171_v4 = vcombine.high %v163_v62, %v163_v62  ;;  %v256_v6 = vcombine.high %v248_v63, %v248_v63  ;;  %v156_v7 = vcombine.high %v81_v60, %v81_v60 }
  0x33   :  { %380 = vmatmul.mubr.f32.vlgmr.msra.gmra.mrb[0].mxu1 %v38_v24  ;;  %1080 = vmatmul.mubr.f32.vlgmr.msra.gmra.mrb[0].mxu0 %v58_v25  ;;  %v241_v8 = vcombine.high %v86_v61, %v86_v61  ;;  %v73_v24 = vld [vmem:[#allocation2 + $0x118] sm:$0xff] }
  0x34   :  { %386 = vmatpush1.xpose.msra.mxu1 %v119_v16  ;;  %1086 = vmatpush1.xpose.msra.mxu0 %v204_v17  ;;  %v170_v9 = vrot.slane %v156_v7, %v1870_v5  ;;  %v82_v17 = vld [vmem:[#allocation4 + $0x20] sm:$0xff] }
  0x35   :  { %449 = vmatprep.mubr.f32.mxu1 %v41_v26  ;;  %1149 = vmatprep.mubr.f32.mxu0 %v61_v27  ;;  %v255_v10 = vrot.slane %v241_v8, %v1870_v5  ;;  %v180_v19 = vrot.slane %v82_v17, %v1870_v5  ;;  %v173_v27 = vcombine.high %v82_v17, %v82_v17 }
  0x36   :  { %455 = vmatprep.subr.mxu1 %v137_v28  ;;  %1155 = vmatprep.subr.mxu0 %v222_v29  ;;  %v172_v15 = vcombine.high %v170_v9, %v170_v9  ;;  %v258_v28 = vcombine.high %v87_v18, %v87_v18 }
  0x37   :  { %v257_v16 = vcombine.high %v255_v10, %v255_v10  ;;  %v188_v25 = vcombine.high %v180_v19, %v180_v19  ;;  %v187_v29 = vrot.slane %v173_v27, %v1870_v5 }
  0x38   :  { %v272_v30 = vrot.slane %v258_v28, %v1870_v5 }
  0x3b   :  { %450 = vmatmul.mubr.f32.vlgmr.msra.gmra.mrb[0].mxu1 %v40_v34  ;;  %1150 = vmatmul.mubr.f32.vlgmr.msra.gmra.mrb[0].mxu0 %v60_v35  ;;  %v75_v34 = vld [vmem:[#allocation2 + $0x128] sm:$0xff]  ;;  %v189_v35 = vcombine.high %v187_v29, %v187_v29 }
  0x3c   :  { %456 = vmatpush1.xpose.msra.mxu1 %v129_v20  ;;  %1156 = vmatpush1.xpose.msra.mxu0 %v214_v21  ;;  %v265_v20 = vrot.slane %v87_v18, %v1870_v5  ;;  %v50_v21 = vld [vmem:[#allocation2 + $0x60] sm:$0xff]  ;;  %v56_v5 = vld [vmem:[#allocation2 + $0x90] sm:$0xff] }
  0x3d   :  { %519 = vmatprep.mubr.f32.mxu1 %v43_v36  ;;  %1219 = vmatprep.mubr.f32.mxu0 %v63_v37  ;;  %v274_v36 = vcombine.high %v272_v30, %v272_v30  ;;  %v54_v37 = vld [vmem:[#allocation2 + $0x80] sm:$0xff] }
  0x3e   :  { %525 = vmatprep.subr.mxu1 %v138_v38  ;;  %1225 = vmatprep.subr.mxu0 %v223_v39  ;;  %v273_v26 = vcombine.high %v265_v20, %v265_v20  ;;  %v74_v38 = vld [vmem:[#allocation2 + $0x120] sm:$0xff]  ;;  %v57_v39 = vld [vmem:[#allocation2 + $0x98] sm:$0xff] }
  0x43   :  { %520 = vmatmul.mubr.f32.vlgmr.msra.gmra.mrb[0].mxu1 %v42_v44  ;;  %1220 = vmatmul.mubr.f32.vlgmr.msra.gmra.mrb[0].mxu0 %v62_v45 }
  0x44   :  { %526 = vmatpush1.xpose.msra.mxu1 %v136_v32  ;;  %1226 = vmatpush1.xpose.msra.mxu0 %v221_v33  ;;  %v72_v32 = vld [vmem:[#allocation2 + $0x110] sm:$0xff]  ;;  %v55_v33 = vld [vmem:[#allocation2 + $0x88] sm:$0xff] }
  0x45   :  { %589 = vmatprep.mubr.f32.mxu1 %v45_v46  ;;  %1289 = vmatprep.mubr.f32.mxu0 %v65_v47 }
  0x46   :  { %595 = vmatprep.subr.mxu1 %v154_v48  ;;  %1295 = vmatprep.subr.mxu0 %v239_v49 }
  0x4b   :  { %590 = vmatmul.mubr.f32.vlgmr.msra.gmra.mrb[0].mxu1 %v44_v54  ;;  %1290 = vmatmul.mubr.f32.vlgmr.msra.gmra.mrb[0].mxu0 %v64_v55 }
  0x4c   :  { %596 = vmatpush1.xpose.msra.mxu1 %v146_v42  ;;  %1296 = vmatpush1.xpose.msra.mxu0 %v231_v43  ;;  %v1723_v42 = vld [vmem:[%s1900_s2] ss:$0 sm:$0xff] }
  0x4d   :  { %659 = vmatprep.mubr.f32.mxu1 %v47_v56  ;;  %1359 = vmatprep.mubr.f32.mxu0 %v67_v57 }
  0x4e   :  { %665 = vmatprep.subr.mxu1 %v155_v58  ;;  %1365 = vmatprep.subr.mxu0 %v240_v59 }
  0x53   :  { %660 = vmatmul.mubr.f32.vlgmr.msra.gmra.mrb[0].mxu1 %v46_v0  ;;  %1360 = vmatmul.mubr.f32.vlgmr.msra.gmra.mrb[0].mxu0 %v66_v1 }
  0x54   :  { %666 = vmatpush1.xpose.msra.mxu1 %v153_v52  ;;  %1366 = vmatpush1.xpose.msra.mxu0 %v238_v53 }
  0x55   :  { %729 = vmatprep.mubr.f32.mxu1 %v49_v2  ;;  %1429 = vmatprep.mubr.f32.mxu0 %v69_v3 }
  0x56   :  { %735 = vmatprep.subr.mxu1 %v171_v4  ;;  %1435 = vmatprep.subr.mxu0 %v256_v6 }
  0x5b   :  { %730 = vmatmul.mubr.f32.vlgmr.msra.gmra.mrb[0].mxu1 %v48_v11  ;;  %1430 = vmatmul.mubr.f32.vlgmr.msra.gmra.mrb[0].mxu0 %v68_v12 }
  0x5c   :  { %736 = vmatpush1.xpose.msra.mxu1 %v163_v62  ;;  %1436 = vmatpush1.xpose.msra.mxu0 %v248_v63 }
  0x5d   :  { %799 = vmatprep.mubr.f32.mxu1 %v51_v13  ;;  %1499 = vmatprep.mubr.f32.mxu0 %v71_v14 }
  0x5e   :  { %805 = vmatprep.subr.mxu1 %v172_v15  ;;  %1505 = vmatprep.subr.mxu0 %v257_v16 }
  0x63   :  { %800 = vmatmul.mubr.f32.vlgmr.msra.gmra.mrb[0].mxu1 %v50_v21  ;;  %1500 = vmatmul.mubr.f32.vlgmr.msra.gmra.mrb[0].mxu0 %v70_v22 }
  0x64   :  { %806 = vmatpush1.xpose.msra.mxu1 %v170_v9  ;;  %1506 = vmatpush1.xpose.msra.mxu0 %v255_v10 }
  0x65   :  { %869 = vmatprep.mubr.f32.mxu1 %v53_v23  ;;  %1569 = vmatprep.mubr.f32.mxu0 %v73_v24 }
  0x66   :  { %875 = vmatprep.subr.mxu1 %v188_v25  ;;  %1575 = vmatprep.subr.mxu0 %v273_v26 }
  0x6b   :  { %870 = vmatmul.mubr.f32.vlgmr.msra.gmra.mrb[0].mxu1 %v52_v31  ;;  %1570 = vmatmul.mubr.f32.vlgmr.msra.gmra.mrb[0].mxu0 %v72_v32 }
  0x6c   :  { %876 = vmatpush1.xpose.msra.mxu1 %v180_v19  ;;  %1576 = vmatpush1.xpose.msra.mxu0 %v265_v20 }
  0x6d   :  { %939 = vmatprep.mubr.f32.mxu1 %v55_v33  ;;  %1639 = vmatprep.mubr.f32.mxu0 %v75_v34 }
  0x6e   :  { %945 = vmatprep.subr.mxu1 %v189_v35  ;;  %1645 = vmatprep.subr.mxu0 %v274_v36 }
  0x73   :  { %940 = vmatmul.mubr.f32.vlgmr.msra.gmra.mrb[0].mxu1 %v54_v37  ;;  %1640 = vmatmul.mubr.f32.vlgmr.msra.gmra.mrb[0].mxu0 %v74_v38 }
  0x74   :  { %946 = vmatpush1.xpose.msra.mxu1 %v187_v29  ;;  %1646 = vmatpush1.xpose.msra.mxu0 %v272_v30 }
  0x75   :  { %1009 = vmatprep.mubr.f32.mxu1 %v57_v39  ;;  %1709 = vmatprep.mubr.f32.mxu0 %v77_v40 }
  0x7b   :  { %1010 = vmatmul.mubr.f32.vlgmr.msra.gmra.mrb[0].mxu1 %v56_v5  ;;  %1710 = vmatmul.mubr.f32.vlgmr.msra.gmra.mrb[0].mxu0 %v76_v41 }
 0x14e   :  { %v1011_v43 = vpop.f32.mrb[0].mxu1  ;;  %v1711_v44 = vpop.f32.mrb[0].mxu0 }
 0x14f   :  { %v1724_v45 = vadd.f32 %v1723_v42, %v1011_v43  ;;  %v1013_v46 = vpop.f32.mrb[1].mxu1  ;;  %v1713_v47 = vpop.f32.mrb[1].mxu0 }
 0x151   :  { %v1725_v48 = vadd.f32 %v1724_v45, %v1711_v44 }
 0x153   :  { %1716 = vst.msk [vmem:[%s1901_s3] sm:$0xff] %vm1715_vm0, %v1725_v48 }
 0x154   :  { %1721 = vsyncpa [#allocation3], 1 }
 0x155   :  { %1722 = vsyncpa [#allocation5], 1 }

</bundles_post_ra>
